<compile_context>
chip_gen: v7x
topology: tpu7x:2x2x1
jax: 0.10.0
libtpu: 0.0.40
codegen_flags: <defaults>
</compile_context>

<pallas_src>
import functools

import jax
import jax.numpy as jnp
from jax import lax
from jax.experimental import pallas as pl
from jax.experimental.pallas import tpu as pltpu


# ----------------------------------------------------------------------------
# Pallas kernel
# ----------------------------------------------------------------------------
def _bilstm_kernel(
    x_ref,      # (T*Bp, 2I)    VMEM  -- row block t holds [x(t) | x(T-1-t)] features
    wih_ref,    # (2I, 8H)      VMEM  -- block rows: [:I]->fwd cols, [I:]->bwd cols
    whh_ref,    # (2H, 8H)      VMEM  -- block-diagonal recurrent weights
    b_ref,      # (1, 8H)       VMEM  -- folded biases (g-gate cols pre-scaled by 2)
    wout_ref,   # (2H, Opad)    VMEM  -- h2o weight (transposed, lane-padded)
    bout_ref,   # (1, Opad)     VMEM
    out_ref,    # (T*Bp, Opad)  VMEM  -- output
    gx_ref,     # (T*Bp, 8H)    VMEM scratch -- hoisted input-gate pre-activations
    hseq_ref,   # (T*Bp, 2H)    VMEM scratch -- [:, :H]=fwd hidden, [:, H:]=bwd hidden
    *,
    seq_len: int,
    batch: int,
    hidden: int,
):
    T, Bp, H = seq_len, batch, hidden

    # (1) Hoisted input projection for both directions in ONE GEMM.  The fwd/bwd time
    # alignment is baked into the x layout + block wih, so each step below reads a
    # single contiguous (Bp, 8H) block -- no per-step select.  g-gate columns arrive
    # pre-scaled by 2 (for the sigmoid-only tanh trick).
    gx_ref[...] = (
        jnp.dot(x_ref[...], wih_ref[...], preferred_element_type=jnp.float32)
        + b_ref[...]
    )

    whh = whh_ref[...]

    h_cat = jnp.zeros((Bp, 2 * H), jnp.float32)   # [h_fwd | h_bwd]
    c_cat = jnp.zeros((Bp, 2 * H), jnp.float32)   # [c_fwd | c_bwd]

    # (2) Fused forward/backward recurrence, fully unrolled (T is static & small).
    for s in range(T):
        t_f = s             # forward direction produces h_fwd for time t_f
        t_b = T - 1 - s     # backward direction produces h_bwd for time t_b

        # One recurrent matmul for both directions (block-diagonal whh).
        gates = (
            jnp.dot(h_cat, whh, preferred_element_type=jnp.float32)
            + gx_ref[pl.ds(s * Bp, Bp), :]
        )

        # (3) Single full-width EUP pass: tanh(z) = 2*sigmoid(2z) - 1, with the 2x
        # already folded into the g-gate weights/bias, so i/f/g/o all come out of
        # one sigmoid over (Bp, 8H); the g fix-up is pure VPU.
        sig = jax.nn.sigmoid(gates)

        i_cat = sig[:, 0 * H:2 * H]               # [i_f | i_b]
        f_cat = sig[:, 2 * H:4 * H]               # [f_f | f_b]
        g_cat = 2.0 * sig[:, 4 * H:6 * H] - 1.0   # tanh of original pre-activation
        o_cat = sig[:, 6 * H:8 * H]               # [o_f | o_b]

        c_cat = f_cat * c_cat + i_cat * g_cat
        h_cat = o_cat * jnp.tanh(c_cat)

        # Stage hidden states time-aligned for the fused output projection.
        hseq_ref[pl.ds(t_f * Bp, Bp), 0:H] = h_cat[:, :H]        # fwd @ time t_f
        hseq_ref[pl.ds(t_b * Bp, Bp), H:2 * H] = h_cat[:, H:]    # bwd @ time t_b

    # (4) Single h2o projection GEMM + lane-dense store (Opad multiple of 128).
    out_ref[...] = (
        jnp.dot(hseq_ref[...], wout_ref[...], preferred_element_type=jnp.float32)
        + bout_ref[...]
    )


# ----------------------------------------------------------------------------
# One-time weight prep (hoisted out of the per-call path)
# ----------------------------------------------------------------------------
def prepare_params(params, input_size, hidden_size, output_size):
    """Re-layout PyTorch LSTM/Linear weights for the kernel.  Call ONCE."""
    I, H, O = input_size, hidden_size, output_size
    f32 = jnp.float32
    Opad = ((O + 127) // 128) * 128          # lane-dense output store

    def interleave_cols(wf, wb):
        # (rows, 4H) x 2 -> (rows, 8H), column order [i_f,i_b,f_f,f_b,g_f,g_b,o_f,o_b]
        r = wf.shape[0]
        return jnp.stack(
            [wf.reshape(r, 4, H), wb.reshape(r, 4, H)], axis=2
        ).reshape(r, 8 * H)

    def scale_g(m):
        # Pre-scale the g-gate columns by 2 so tanh(z) = 2*sigmoid(2z) - 1 in-kernel.
        return m.at[..., 4 * H:6 * H].multiply(2.0)

    # Block input weights: rows [:I] feed the fwd gate columns with x(t),
    # rows [I:] feed the bwd gate columns with x(T-1-t).
    wih_f = params["weight_ih_l0"].T.astype(f32)            # (I, 4H)
    wih_b = params["weight_ih_l0_reverse"].T.astype(f32)    # (I, 4H)
    wih = jnp.zeros((2 * I, 8 * H), f32)
    wih = wih.at[:I].set(interleave_cols(wih_f, jnp.zeros_like(wih_f)))
    wih = wih.at[I:].set(interleave_cols(jnp.zeros_like(wih_b), wih_b))
    wih = scale_g(wih)

    # Folded biases, interleaved the same way.
    b_f = (params["bias_ih_l0"] + params["bias_hh_l0"]).reshape(1, 4 * H).astype(f32)
    b_b = (params["bias_ih_l0_reverse"] + params["bias_hh_l0_reverse"]).reshape(1, 4 * H).astype(f32)
    b = scale_g(interleave_cols(b_f, b_b))                   # (1, 8H)

    # Block-diagonal recurrent weight: rows [:H] -> fwd gate columns, rows [H:] -> bwd.
    whh_f = params["weight_hh_l0"].T.astype(f32)             # (H, 4H)
    whh_b = params["weight_hh_l0_reverse"].T.astype(f32)     # (H, 4H)
    whh = jnp.zeros((2 * H, 8 * H), f32)
    whh = whh.at[:H].set(interleave_cols(whh_f, jnp.zeros_like(whh_f)))
    whh = whh.at[H:].set(interleave_cols(jnp.zeros_like(whh_b), whh_b))
    whh = scale_g(whh)

    # Output head (transposed, lane-padded).
    wout = jnp.zeros((2 * H, Opad), f32).at[:, :O].set(params["h2o_weight"].T.astype(f32))
    bout = jnp.zeros((1, Opad), f32).at[:, :O].set(params["h2o_bias"].reshape(1, O).astype(f32))

    return {"wih": wih, "whh": whh, "b": b, "wout": wout, "bout": bout}


# ----------------------------------------------------------------------------
# Per-call wrapper (jitted): x padding/flatten + pallas_call only
# ----------------------------------------------------------------------------
@functools.partial(jax.jit, static_argnames=("hidden_size", "output_size"))
def rnn_forward(x, prepped, *, hidden_size, output_size):
    """x: (T, B, I) float32.  prepped: output of prepare_params."""
    T, B, I = x.shape
    H = hidden_size
    O = output_size
    f32 = jnp.float32

    Bp = max(8, ((B + 7) // 8) * 8)          # pad batch to sublane width
    Opad = prepped["wout"].shape[1]

    # Batch-pad, then lay out per time step: [x(t) | x(T-1-t)] along features so the
    # kernel's hoisted GEMM produces time-aligned fwd/bwd gate pre-activations.
    x_pad = jnp.zeros((T, Bp, I), f32).at[:, :B].set(x.astype(f32))
    x_both = jnp.concatenate([x_pad, x_pad[::-1]], axis=-1).reshape(T * Bp, 2 * I)

    kernel = functools.partial(_bilstm_kernel, seq_len=T, batch=Bp, hidden=H)
    vmem = pl.BlockSpec(memory_space=pltpu.MemorySpace.VMEM)

    out_flat = pl.pallas_call(
        kernel,
        out_shape=jax.ShapeDtypeStruct((T * Bp, Opad), f32),
        in_specs=[vmem] * 6,
        out_specs=vmem,
        scratch_shapes=[
            pltpu.VMEM((T * Bp, 8 * H), f32),   # hoisted input-gate pre-activations
            pltpu.VMEM((T * Bp, 2 * H), f32),   # staged hidden states (fwd | bwd)
        ],
    )(x_both, prepped["wih"], prepped["whh"], prepped["b"],
      prepped["wout"], prepped["bout"])

    return out_flat.reshape(T, Bp, Opad)[:, :B, :O]


# ----------------------------------------------------------------------------
# Pure-JAX reference (for correctness check)
# ----------------------------------------------------------------------------
def _lstm_dir_ref(x, wih, whh, b, reverse):
    def step(carry, x_t):
        h, c = carry
        gates = x_t @ wih.T + h @ whh.T + b
        i_g, f_g, g_g, o_g = jnp.split(gates, 4, axis=-1)
        i_g = jax.nn.sigmoid(i_g)
        f_g = jax.nn.sigmoid(f_g)
        g_g = jnp.tanh(g_g)
        o_g = jax.nn.sigmoid(o_g)
        c = f_g * c + i_g * g_g
        h = o_g * jnp.tanh(c)
        return (h, c), h

    T, B, _ = x.shape
    H = whh.shape[1]
    xs = x[::-1] if reverse else x
    init = (jnp.zeros((B, H), jnp.float32), jnp.zeros((B, H), jnp.float32))
    _, hs = lax.scan(step, init, xs)
    return hs[::-1] if reverse else hs


def rnn_forward_ref(x, params):
    h_f = _lstm_dir_ref(
        x, params["weight_ih_l0"], params["weight_hh_l0"],
        params["bias_ih_l0"] + params["bias_hh_l0"], reverse=False)
    h_b = _lstm_dir_ref(
        x, params["weight_ih_l0_reverse"], params["weight_hh_l0_reverse"],
        params["bias_ih_l0_reverse"] + params["bias_hh_l0_reverse"], reverse=True)
    out = jnp.concatenate([h_f, h_b], axis=-1)
    return out @ params["h2o_weight"].T + params["h2o_bias"]


# ----------------------------------------------------------------------------
# Main
# ----------------------------------------------------------------------------
if __name__ == "__main__":
    INPUT_SIZE = 16
    HIDDEN_SIZE = 32
    OUTPUT_SIZE = 10
    SEQ_LEN = 8
    BATCH = 2

    key = jax.random.PRNGKey(0)
    keys = jax.random.split(key, 12)
    kstd = 1.0 / jnp.sqrt(HIDDEN_SIZE)
    lstd = 1.0 / jnp.sqrt(2 * HIDDEN_SIZE)

    def u(k, shape, s):
        return jax.random.uniform(k, shape, jnp.float32, -s, s)

    params = {
        "weight_ih_l0":          u(keys[0], (4 * HIDDEN_SIZE, INPUT_SIZE), kstd),
        "weight_hh_l0":          u(keys[1], (4 * HIDDEN_SIZE, HIDDEN_SIZE), kstd),
        "bias_ih_l0":            u(keys[2], (4 * HIDDEN_SIZE,), kstd),
        "bias_hh_l0":            u(keys[3], (4 * HIDDEN_SIZE,), kstd),
        "weight_ih_l0_reverse":  u(keys[4], (4 * HIDDEN_SIZE, INPUT_SIZE), kstd),
        "weight_hh_l0_reverse":  u(keys[5], (4 * HIDDEN_SIZE, HIDDEN_SIZE), kstd),
        "bias_ih_l0_reverse":    u(keys[6], (4 * HIDDEN_SIZE,), kstd),
        "bias_hh_l0_reverse":    u(keys[7], (4 * HIDDEN_SIZE,), kstd),
        "h2o_weight":            u(keys[8], (OUTPUT_SIZE, 2 * HIDDEN_SIZE), lstd),
        "h2o_bias":              u(keys[9], (OUTPUT_SIZE,), lstd),
    }

    x = jax.random.normal(keys[10], (SEQ_LEN, BATCH, INPUT_SIZE), jnp.float32)

    # One-time weight re-layout (hoisted out of the per-call path).
    prepped = jax.tree_util.tree_map(jax.block_until_ready,
                                     prepare_params(params, INPUT_SIZE, HIDDEN_SIZE, OUTPUT_SIZE))

    out = rnn_forward(x, prepped, hidden_size=HIDDEN_SIZE, output_size=OUTPUT_SIZE)
    out = jax.block_until_ready(out)

    ref = jax.block_until_ready(rnn_forward_ref(x, params))
    assert out.shape == (SEQ_LEN, BATCH, OUTPUT_SIZE)
    err = float(jnp.max(jnp.abs(out - ref)))
    assert jnp.allclose(out, ref, atol=1e-4, rtol=1e-4), err

    print("KERNEL_OK")
</pallas_src>

<mosaic_0001>
module attributes {stable_mosaic.version = 11 : i64} {
  func.func @_bilstm_kernel(%arg0: memref<64x32xf32, #tpu.memory_space<vmem>>, %arg1: memref<32x256xf32, #tpu.memory_space<vmem>>, %arg2: memref<64x256xf32, #tpu.memory_space<vmem>>, %arg3: memref<1x256xf32, #tpu.memory_space<vmem>>, %arg4: memref<64x128xf32, #tpu.memory_space<vmem>>, %arg5: memref<1x128xf32, #tpu.memory_space<vmem>>, %arg6: memref<64x128xf32, #tpu.memory_space<vmem>>, %arg7: memref<64x256xf32, #tpu.memory_space<vmem>>, %arg8: memref<64x64xf32, #tpu.memory_space<vmem>>) attributes {dimension_semantics = [], scalar_prefetch = 0 : i64, scratch_operands = 2 : i64, tpu.core_type = #tpu.core_type<tc>} {
    %c0 = arith.constant 0 : index
    %c0_0 = arith.constant 0 : index
    %0 = vector.load %arg0[%c0, %c0_0] : memref<64x32xf32, #tpu.memory_space<vmem>>, vector<64x32xf32>
    %c0_1 = arith.constant 0 : index
    %c0_2 = arith.constant 0 : index
    %1 = vector.load %arg1[%c0_1, %c0_2] : memref<32x256xf32, #tpu.memory_space<vmem>>, vector<32x256xf32>
    %cst = arith.constant dense<0.000000e+00> : vector<64x256xf32>
    %2 = tpu.matmul %0, %1, %cst {dimension_numbers = #tpu.dot_dimension_numbers<[1], [0], [0], [1], [0, 0, 1, 1], [], []>} : vector<64x32xf32>, vector<32x256xf32>, vector<64x256xf32> -> vector<64x256xf32>
    %c0_3 = arith.constant 0 : index
    %c0_4 = arith.constant 0 : index
    %3 = vector.load %arg3[%c0_3, %c0_4] : memref<1x256xf32, #tpu.memory_space<vmem>>, vector<1x256xf32>
    %4 = vector.broadcast %3 : vector<1x256xf32> to vector<64x256xf32>
    %5 = arith.addf %2, %4 : vector<64x256xf32>
    %c0_5 = arith.constant 0 : index
    %c0_6 = arith.constant 0 : index
    %6 = vector.load %arg7[%c0_5, %c0_6] : memref<64x256xf32, #tpu.memory_space<vmem>>, vector<64x256xf32>
    tpu.vector_store %arg7[%c0_5, %c0_6], %5 {strides = array<i32>} : memref<64x256xf32, #tpu.memory_space<vmem>>, vector<64x256xf32>,
    %c0_7 = arith.constant 0 : index
    %c0_8 = arith.constant 0 : index
    %7 = vector.load %arg2[%c0_7, %c0_8] : memref<64x256xf32, #tpu.memory_space<vmem>>, vector<64x256xf32>
    %cst_9 = arith.constant 0.000000e+00 : f32
    %8 = vector.broadcast %cst_9 : f32 to vector<8x64xf32>
    %cst_10 = arith.constant 0.000000e+00 : f32
    %9 = vector.broadcast %cst_10 : f32 to vector<8x64xf32>
    %cst_11 = arith.constant dense<0.000000e+00> : vector<8x256xf32>
    %10 = tpu.matmul %8, %7, %cst_11 {dimension_numbers = #tpu.dot_dimension_numbers<[1], [0], [0], [1], [0, 0, 1, 1], [], []>} : vector<8x64xf32>, vector<64x256xf32>, vector<8x256xf32> -> vector<8x256xf32>
    %c0_12 = arith.constant 0 : index
    %c0_13 = arith.constant 0 : index
    %11 = vector.load %arg7[%c0_12, %c0_13] : memref<64x256xf32, #tpu.memory_space<vmem>>, vector<8x256xf32>
    %12 = arith.addf %10, %11 : vector<8x256xf32>
    %13 = arith.negf %12 : vector<8x256xf32>
    %14 = math.exp %13 : vector<8x256xf32>
    %cst_14 = arith.constant 1.000000e+00 : f32
    %15 = vector.broadcast %cst_14 : f32 to vector<8x256xf32>
    %16 = arith.addf %15, %14 : vector<8x256xf32>
    %17 = arith.divf %15, %16 : vector<8x256xf32>
    %18 = vector.extract_strided_slice %17 {offsets = [0, 0], sizes = [8, 64], strides = [1, 1]} : vector<8x256xf32> to vector<8x64xf32>
    %19 = vector.extract_strided_slice %17 {offsets = [0, 64], sizes = [8, 64], strides = [1, 1]} : vector<8x256xf32> to vector<8x64xf32>
    %20 = vector.extract_strided_slice %17 {offsets = [0, 128], sizes = [8, 64], strides = [1, 1]} : vector<8x256xf32> to vector<8x64xf32>
    %cst_15 = arith.constant 2.000000e+00 : f32
    %21 = vector.broadcast %cst_15 : f32 to vector<8x64xf32>
    %22 = arith.mulf %21, %20 : vector<8x64xf32>
    %cst_16 = arith.constant 1.000000e+00 : f32
    %23 = vector.broadcast %cst_16 : f32 to vector<8x64xf32>
    %24 = arith.subf %22, %23 : vector<8x64xf32>
    %25 = vector.extract_strided_slice %17 {offsets = [0, 192], sizes = [8, 64], strides = [1, 1]} : vector<8x256xf32> to vector<8x64xf32>
    %26 = arith.mulf %19, %9 : vector<8x64xf32>
    %27 = arith.mulf %18, %24 : vector<8x64xf32>
    %28 = arith.addf %26, %27 : vector<8x64xf32>
    %29 = math.tanh %28 : vector<8x64xf32>
    %30 = arith.mulf %25, %29 : vector<8x64xf32>
    %31 = vector.extract_strided_slice %30 {offsets = [0, 0], sizes = [8, 32], strides = [1, 1]} : vector<8x64xf32> to vector<8x32xf32>
    %c0_17 = arith.constant 0 : index
    %c0_18 = arith.constant 0 : index
    %32 = vector.load %arg8[%c0_17, %c0_18] : memref<64x64xf32, #tpu.memory_space<vmem>>, vector<8x32xf32>
    tpu.vector_store %arg8[%c0_17, %c0_18], %31 {strides = array<i32>} : memref<64x64xf32, #tpu.memory_space<vmem>>, vector<8x32xf32>,
    %33 = vector.extract_strided_slice %30 {offsets = [0, 32], sizes = [8, 32], strides = [1, 1]} : vector<8x64xf32> to vector<8x32xf32>
    %c56 = arith.constant 56 : index
    %c32 = arith.constant 32 : index
    %34 = vector.load %arg8[%c56, %c32] : memref<64x64xf32, #tpu.memory_space<vmem>>, vector<8x32xf32>
    tpu.vector_store %arg8[%c56, %c32], %33 {strides = array<i32>} : memref<64x64xf32, #tpu.memory_space<vmem>>, vector<8x32xf32>,
    %cst_19 = arith.constant dense<0.000000e+00> : vector<8x256xf32>
    %35 = tpu.matmul %30, %7, %cst_19 {dimension_numbers = #tpu.dot_dimension_numbers<[1], [0], [0], [1], [0, 0, 1, 1], [], []>} : vector<8x64xf32>, vector<64x256xf32>, vector<8x256xf32> -> vector<8x256xf32>
    %c8 = arith.constant 8 : index
    %c0_20 = arith.constant 0 : index
    %36 = vector.load %arg7[%c8, %c0_20] : memref<64x256xf32, #tpu.memory_space<vmem>>, vector<8x256xf32>
    %37 = arith.addf %35, %36 : vector<8x256xf32>
    %38 = arith.negf %37 : vector<8x256xf32>
    %39 = math.exp %38 : vector<8x256xf32>
    %cst_21 = arith.constant 1.000000e+00 : f32
    %40 = vector.broadcast %cst_21 : f32 to vector<8x256xf32>
    %41 = arith.addf %40, %39 : vector<8x256xf32>
    %42 = arith.divf %40, %41 : vector<8x256xf32>
    %43 = vector.extract_strided_slice %42 {offsets = [0, 0], sizes = [8, 64], strides = [1, 1]} : vector<8x256xf32> to vector<8x64xf32>
    %44 = vector.extract_strided_slice %42 {offsets = [0, 64], sizes = [8, 64], strides = [1, 1]} : vector<8x256xf32> to vector<8x64xf32>
    %45 = vector.extract_strided_slice %42 {offsets = [0, 128], sizes = [8, 64], strides = [1, 1]} : vector<8x256xf32> to vector<8x64xf32>
    %cst_22 = arith.constant 2.000000e+00 : f32
    %46 = vector.broadcast %cst_22 : f32 to vector<8x64xf32>
    %47 = arith.mulf %46, %45 : vector<8x64xf32>
    %cst_23 = arith.constant 1.000000e+00 : f32
    %48 = vector.broadcast %cst_23 : f32 to vector<8x64xf32>
    %49 = arith.subf %47, %48 : vector<8x64xf32>
    %50 = vector.extract_strided_slice %42 {offsets = [0, 192], sizes = [8, 64], strides = [1, 1]} : vector<8x256xf32> to vector<8x64xf32>
    %51 = arith.mulf %44, %28 : vector<8x64xf32>
    %52 = arith.mulf %43, %49 : vector<8x64xf32>
    %53 = arith.addf %51, %52 : vector<8x64xf32>
    %54 = math.tanh %53 : vector<8x64xf32>
    %55 = arith.mulf %50, %54 : vector<8x64xf32>
    %56 = vector.extract_strided_slice %55 {offsets = [0, 0], sizes = [8, 32], strides = [1, 1]} : vector<8x64xf32> to vector<8x32xf32>
    %c8_24 = arith.constant 8 : index
    %c0_25 = arith.constant 0 : index
    %57 = vector.load %arg8[%c8_24, %c0_25] : memref<64x64xf32, #tpu.memory_space<vmem>>, vector<8x32xf32>
    tpu.vector_store %arg8[%c8_24, %c0_25], %56 {strides = array<i32>} : memref<64x64xf32, #tpu.memory_space<vmem>>, vector<8x32xf32>,
    %58 = vector.extract_strided_slice %55 {offsets = [0, 32], sizes = [8, 32], strides = [1, 1]} : vector<8x64xf32> to vector<8x32xf32>
    %c48 = arith.constant 48 : index
    %c32_26 = arith.constant 32 : index
    %59 = vector.load %arg8[%c48, %c32_26] : memref<64x64xf32, #tpu.memory_space<vmem>>, vector<8x32xf32>
    tpu.vector_store %arg8[%c48, %c32_26], %58 {strides = array<i32>} : memref<64x64xf32, #tpu.memory_space<vmem>>, vector<8x32xf32>,
    %cst_27 = arith.constant dense<0.000000e+00> : vector<8x256xf32>
    %60 = tpu.matmul %55, %7, %cst_27 {dimension_numbers = #tpu.dot_dimension_numbers<[1], [0], [0], [1], [0, 0, 1, 1], [], []>} : vector<8x64xf32>, vector<64x256xf32>, vector<8x256xf32> -> vector<8x256xf32>
    %c16 = arith.constant 16 : index
    %c0_28 = arith.constant 0 : index
    %61 = vector.load %arg7[%c16, %c0_28] : memref<64x256xf32, #tpu.memory_space<vmem>>, vector<8x256xf32>
    %62 = arith.addf %60, %61 : vector<8x256xf32>
    %63 = arith.negf %62 : vector<8x256xf32>
    %64 = math.exp %63 : vector<8x256xf32>
    %cst_29 = arith.constant 1.000000e+00 : f32
    %65 = vector.broadcast %cst_29 : f32 to vector<8x256xf32>
    %66 = arith.addf %65, %64 : vector<8x256xf32>
    %67 = arith.divf %65, %66 : vector<8x256xf32>
    %68 = vector.extract_strided_slice %67 {offsets = [0, 0], sizes = [8, 64], strides = [1, 1]} : vector<8x256xf32> to vector<8x64xf32>
    %69 = vector.extract_strided_slice %67 {offsets = [0, 64], sizes = [8, 64], strides = [1, 1]} : vector<8x256xf32> to vector<8x64xf32>
    %70 = vector.extract_strided_slice %67 {offsets = [0, 128], sizes = [8, 64], strides = [1, 1]} : vector<8x256xf32> to vector<8x64xf32>
    %cst_30 = arith.constant 2.000000e+00 : f32
    %71 = vector.broadcast %cst_30 : f32 to vector<8x64xf32>
    %72 = arith.mulf %71, %70 : vector<8x64xf32>
    %cst_31 = arith.constant 1.000000e+00 : f32
    %73 = vector.broadcast %cst_31 : f32 to vector<8x64xf32>
    %74 = arith.subf %72, %73 : vector<8x64xf32>
    %75 = vector.extract_strided_slice %67 {offsets = [0, 192], sizes = [8, 64], strides = [1, 1]} : vector<8x256xf32> to vector<8x64xf32>
    %76 = arith.mulf %69, %53 : vector<8x64xf32>
    %77 = arith.mulf %68, %74 : vector<8x64xf32>
    %78 = arith.addf %76, %77 : vector<8x64xf32>
    %79 = math.tanh %78 : vector<8x64xf32>
    %80 = arith.mulf %75, %79 : vector<8x64xf32>
    %81 = vector.extract_strided_slice %80 {offsets = [0, 0], sizes = [8, 32], strides = [1, 1]} : vector<8x64xf32> to vector<8x32xf32>
    %c16_32 = arith.constant 16 : index
    %c0_33 = arith.constant 0 : index
    %82 = vector.load %arg8[%c16_32, %c0_33] : memref<64x64xf32, #tpu.memory_space<vmem>>, vector<8x32xf32>
    tpu.vector_store %arg8[%c16_32, %c0_33], %81 {strides = array<i32>} : memref<64x64xf32, #tpu.memory_space<vmem>>, vector<8x32xf32>,
    %83 = vector.extract_strided_slice %80 {offsets = [0, 32], sizes = [8, 32], strides = [1, 1]} : vector<8x64xf32> to vector<8x32xf32>
    %c40 = arith.constant 40 : index
    %c32_34 = arith.constant 32 : index
    %84 = vector.load %arg8[%c40, %c32_34] : memref<64x64xf32, #tpu.memory_space<vmem>>, vector<8x32xf32>
    tpu.vector_store %arg8[%c40, %c32_34], %83 {strides = array<i32>} : memref<64x64xf32, #tpu.memory_space<vmem>>, vector<8x32xf32>,
    %cst_35 = arith.constant dense<0.000000e+00> : vector<8x256xf32>
    %85 = tpu.matmul %80, %7, %cst_35 {dimension_numbers = #tpu.dot_dimension_numbers<[1], [0], [0], [1], [0, 0, 1, 1], [], []>} : vector<8x64xf32>, vector<64x256xf32>, vector<8x256xf32> -> vector<8x256xf32>
    %c24 = arith.constant 24 : index
    %c0_36 = arith.constant 0 : index
    %86 = vector.load %arg7[%c24, %c0_36] : memref<64x256xf32, #tpu.memory_space<vmem>>, vector<8x256xf32>
    %87 = arith.addf %85, %86 : vector<8x256xf32>
    %88 = arith.negf %87 : vector<8x256xf32>
    %89 = math.exp %88 : vector<8x256xf32>
    %cst_37 = arith.constant 1.000000e+00 : f32
    %90 = vector.broadcast %cst_37 : f32 to vector<8x256xf32>
    %91 = arith.addf %90, %89 : vector<8x256xf32>
    %92 = arith.divf %90, %91 : vector<8x256xf32>
    %93 = vector.extract_strided_slice %92 {offsets = [0, 0], sizes = [8, 64], strides = [1, 1]} : vector<8x256xf32> to vector<8x64xf32>
    %94 = vector.extract_strided_slice %92 {offsets = [0, 64], sizes = [8, 64], strides = [1, 1]} : vector<8x256xf32> to vector<8x64xf32>
    %95 = vector.extract_strided_slice %92 {offsets = [0, 128], sizes = [8, 64], strides = [1, 1]} : vector<8x256xf32> to vector<8x64xf32>
    %cst_38 = arith.constant 2.000000e+00 : f32
    %96 = vector.broadcast %cst_38 : f32 to vector<8x64xf32>
    %97 = arith.mulf %96, %95 : vector<8x64xf32>
    %cst_39 = arith.constant 1.000000e+00 : f32
    %98 = vector.broadcast %cst_39 : f32 to vector<8x64xf32>
    %99 = arith.subf %97, %98 : vector<8x64xf32>
    %100 = vector.extract_strided_slice %92 {offsets = [0, 192], sizes = [8, 64], strides = [1, 1]} : vector<8x256xf32> to vector<8x64xf32>
    %101 = arith.mulf %94, %78 : vector<8x64xf32>
    %102 = arith.mulf %93, %99 : vector<8x64xf32>
    %103 = arith.addf %101, %102 : vector<8x64xf32>
    %104 = math.tanh %103 : vector<8x64xf32>
    %105 = arith.mulf %100, %104 : vector<8x64xf32>
    %106 = vector.extract_strided_slice %105 {offsets = [0, 0], sizes = [8, 32], strides = [1, 1]} : vector<8x64xf32> to vector<8x32xf32>
    %c24_40 = arith.constant 24 : index
    %c0_41 = arith.constant 0 : index
    %107 = vector.load %arg8[%c24_40, %c0_41] : memref<64x64xf32, #tpu.memory_space<vmem>>, vector<8x32xf32>
    tpu.vector_store %arg8[%c24_40, %c0_41], %106 {strides = array<i32>} : memref<64x64xf32, #tpu.memory_space<vmem>>, vector<8x32xf32>,
    %108 = vector.extract_strided_slice %105 {offsets = [0, 32], sizes = [8, 32], strides = [1, 1]} : vector<8x64xf32> to vector<8x32xf32>
    %c32_42 = arith.constant 32 : index
    %c32_43 = arith.constant 32 : index
    %109 = vector.load %arg8[%c32_42, %c32_43] : memref<64x64xf32, #tpu.memory_space<vmem>>, vector<8x32xf32>
    tpu.vector_store %arg8[%c32_42, %c32_43], %108 {strides = array<i32>} : memref<64x64xf32, #tpu.memory_space<vmem>>, vector<8x32xf32>,
    %cst_44 = arith.constant dense<0.000000e+00> : vector<8x256xf32>
    %110 = tpu.matmul %105, %7, %cst_44 {dimension_numbers = #tpu.dot_dimension_numbers<[1], [0], [0], [1], [0, 0, 1, 1], [], []>} : vector<8x64xf32>, vector<64x256xf32>, vector<8x256xf32> -> vector<8x256xf32>
    %c32_45 = arith.constant 32 : index
    %c0_46 = arith.constant 0 : index
    %111 = vector.load %arg7[%c32_45, %c0_46] : memref<64x256xf32, #tpu.memory_space<vmem>>, vector<8x256xf32>
    %112 = arith.addf %110, %111 : vector<8x256xf32>
    %113 = arith.negf %112 : vector<8x256xf32>
    %114 = math.exp %113 : vector<8x256xf32>
    %cst_47 = arith.constant 1.000000e+00 : f32
    %115 = vector.broadcast %cst_47 : f32 to vector<8x256xf32>
    %116 = arith.addf %115, %114 : vector<8x256xf32>
    %117 = arith.divf %115, %116 : vector<8x256xf32>
    %118 = vector.extract_strided_slice %117 {offsets = [0, 0], sizes = [8, 64], strides = [1, 1]} : vector<8x256xf32> to vector<8x64xf32>
    %119 = vector.extract_strided_slice %117 {offsets = [0, 64], sizes = [8, 64], strides = [1, 1]} : vector<8x256xf32> to vector<8x64xf32>
    %120 = vector.extract_strided_slice %117 {offsets = [0, 128], sizes = [8, 64], strides = [1, 1]} : vector<8x256xf32> to vector<8x64xf32>
    %cst_48 = arith.constant 2.000000e+00 : f32
    %121 = vector.broadcast %cst_48 : f32 to vector<8x64xf32>
    %122 = arith.mulf %121, %120 : vector<8x64xf32>
    %cst_49 = arith.constant 1.000000e+00 : f32
    %123 = vector.broadcast %cst_49 : f32 to vector<8x64xf32>
    %124 = arith.subf %122, %123 : vector<8x64xf32>
    %125 = vector.extract_strided_slice %117 {offsets = [0, 192], sizes = [8, 64], strides = [1, 1]} : vector<8x256xf32> to vector<8x64xf32>
    %126 = arith.mulf %119, %103 : vector<8x64xf32>
    %127 = arith.mulf %118, %124 : vector<8x64xf32>
    %128 = arith.addf %126, %127 : vector<8x64xf32>
    %129 = math.tanh %128 : vector<8x64xf32>
    %130 = arith.mulf %125, %129 : vector<8x64xf32>
    %131 = vector.extract_strided_slice %130 {offsets = [0, 0], sizes = [8, 32], strides = [1, 1]} : vector<8x64xf32> to vector<8x32xf32>
    %c32_50 = arith.constant 32 : index
    %c0_51 = arith.constant 0 : index
    %132 = vector.load %arg8[%c32_50, %c0_51] : memref<64x64xf32, #tpu.memory_space<vmem>>, vector<8x32xf32>
    tpu.vector_store %arg8[%c32_50, %c0_51], %131 {strides = array<i32>} : memref<64x64xf32, #tpu.memory_space<vmem>>, vector<8x32xf32>,
    %133 = vector.extract_strided_slice %130 {offsets = [0, 32], sizes = [8, 32], strides = [1, 1]} : vector<8x64xf32> to vector<8x32xf32>
    %c24_52 = arith.constant 24 : index
    %c32_53 = arith.constant 32 : index
    %134 = vector.load %arg8[%c24_52, %c32_53] : memref<64x64xf32, #tpu.memory_space<vmem>>, vector<8x32xf32>
    tpu.vector_store %arg8[%c24_52, %c32_53], %133 {strides = array<i32>} : memref<64x64xf32, #tpu.memory_space<vmem>>, vector<8x32xf32>,
    %cst_54 = arith.constant dense<0.000000e+00> : vector<8x256xf32>
    %135 = tpu.matmul %130, %7, %cst_54 {dimension_numbers = #tpu.dot_dimension_numbers<[1], [0], [0], [1], [0, 0, 1, 1], [], []>} : vector<8x64xf32>, vector<64x256xf32>, vector<8x256xf32> -> vector<8x256xf32>
    %c40_55 = arith.constant 40 : index
    %c0_56 = arith.constant 0 : index
    %136 = vector.load %arg7[%c40_55, %c0_56] : memref<64x256xf32, #tpu.memory_space<vmem>>, vector<8x256xf32>
    %137 = arith.addf %135, %136 : vector<8x256xf32>
    %138 = arith.negf %137 : vector<8x256xf32>
    %139 = math.exp %138 : vector<8x256xf32>
    %cst_57 = arith.constant 1.000000e+00 : f32
    %140 = vector.broadcast %cst_57 : f32 to vector<8x256xf32>
    %141 = arith.addf %140, %139 : vector<8x256xf32>
    %142 = arith.divf %140, %141 : vector<8x256xf32>
    %143 = vector.extract_strided_slice %142 {offsets = [0, 0], sizes = [8, 64], strides = [1, 1]} : vector<8x256xf32> to vector<8x64xf32>
    %144 = vector.extract_strided_slice %142 {offsets = [0, 64], sizes = [8, 64], strides = [1, 1]} : vector<8x256xf32> to vector<8x64xf32>
    %145 = vector.extract_strided_slice %142 {offsets = [0, 128], sizes = [8, 64], strides = [1, 1]} : vector<8x256xf32> to vector<8x64xf32>
    %cst_58 = arith.constant 2.000000e+00 : f32
    %146 = vector.broadcast %cst_58 : f32 to vector<8x64xf32>
    %147 = arith.mulf %146, %145 : vector<8x64xf32>
    %cst_59 = arith.constant 1.000000e+00 : f32
    %148 = vector.broadcast %cst_59 : f32 to vector<8x64xf32>
    %149 = arith.subf %147, %148 : vector<8x64xf32>
    %150 = vector.extract_strided_slice %142 {offsets = [0, 192], sizes = [8, 64], strides = [1, 1]} : vector<8x256xf32> to vector<8x64xf32>
    %151 = arith.mulf %144, %128 : vector<8x64xf32>
    %152 = arith.mulf %143, %149 : vector<8x64xf32>
    %153 = arith.addf %151, %152 : vector<8x64xf32>
    %154 = math.tanh %153 : vector<8x64xf32>
    %155 = arith.mulf %150, %154 : vector<8x64xf32>
    %156 = vector.extract_strided_slice %155 {offsets = [0, 0], sizes = [8, 32], strides = [1, 1]} : vector<8x64xf32> to vector<8x32xf32>
    %c40_60 = arith.constant 40 : index
    %c0_61 = arith.constant 0 : index
    %157 = vector.load %arg8[%c40_60, %c0_61] : memref<64x64xf32, #tpu.memory_space<vmem>>, vector<8x32xf32>
    tpu.vector_store %arg8[%c40_60, %c0_61], %156 {strides = array<i32>} : memref<64x64xf32, #tpu.memory_space<vmem>>, vector<8x32xf32>,
    %158 = vector.extract_strided_slice %155 {offsets = [0, 32], sizes = [8, 32], strides = [1, 1]} : vector<8x64xf32> to vector<8x32xf32>
    %c16_62 = arith.constant 16 : index
    %c32_63 = arith.constant 32 : index
    %159 = vector.load %arg8[%c16_62, %c32_63] : memref<64x64xf32, #tpu.memory_space<vmem>>, vector<8x32xf32>
    tpu.vector_store %arg8[%c16_62, %c32_63], %158 {strides = array<i32>} : memref<64x64xf32, #tpu.memory_space<vmem>>, vector<8x32xf32>,
    %cst_64 = arith.constant dense<0.000000e+00> : vector<8x256xf32>
    %160 = tpu.matmul %155, %7, %cst_64 {dimension_numbers = #tpu.dot_dimension_numbers<[1], [0], [0], [1], [0, 0, 1, 1], [], []>} : vector<8x64xf32>, vector<64x256xf32>, vector<8x256xf32> -> vector<8x256xf32>
    %c48_65 = arith.constant 48 : index
    %c0_66 = arith.constant 0 : index
    %161 = vector.load %arg7[%c48_65, %c0_66] : memref<64x256xf32, #tpu.memory_space<vmem>>, vector<8x256xf32>
    %162 = arith.addf %160, %161 : vector<8x256xf32>
    %163 = arith.negf %162 : vector<8x256xf32>
    %164 = math.exp %163 : vector<8x256xf32>
    %cst_67 = arith.constant 1.000000e+00 : f32
    %165 = vector.broadcast %cst_67 : f32 to vector<8x256xf32>
    %166 = arith.addf %165, %164 : vector<8x256xf32>
    %167 = arith.divf %165, %166 : vector<8x256xf32>
    %168 = vector.extract_strided_slice %167 {offsets = [0, 0], sizes = [8, 64], strides = [1, 1]} : vector<8x256xf32> to vector<8x64xf32>
    %169 = vector.extract_strided_slice %167 {offsets = [0, 64], sizes = [8, 64], strides = [1, 1]} : vector<8x256xf32> to vector<8x64xf32>
    %170 = vector.extract_strided_slice %167 {offsets = [0, 128], sizes = [8, 64], strides = [1, 1]} : vector<8x256xf32> to vector<8x64xf32>
    %cst_68 = arith.constant 2.000000e+00 : f32
    %171 = vector.broadcast %cst_68 : f32 to vector<8x64xf32>
    %172 = arith.mulf %171, %170 : vector<8x64xf32>
    %cst_69 = arith.constant 1.000000e+00 : f32
    %173 = vector.broadcast %cst_69 : f32 to vector<8x64xf32>
    %174 = arith.subf %172, %173 : vector<8x64xf32>
    %175 = vector.extract_strided_slice %167 {offsets = [0, 192], sizes = [8, 64], strides = [1, 1]} : vector<8x256xf32> to vector<8x64xf32>
    %176 = arith.mulf %169, %153 : vector<8x64xf32>
    %177 = arith.mulf %168, %174 : vector<8x64xf32>
    %178 = arith.addf %176, %177 : vector<8x64xf32>
    %179 = math.tanh %178 : vector<8x64xf32>
    %180 = arith.mulf %175, %179 : vector<8x64xf32>
    %181 = vector.extract_strided_slice %180 {offsets = [0, 0], sizes = [8, 32], strides = [1, 1]} : vector<8x64xf32> to vector<8x32xf32>
    %c48_70 = arith.constant 48 : index
    %c0_71 = arith.constant 0 : index
    %182 = vector.load %arg8[%c48_70, %c0_71] : memref<64x64xf32, #tpu.memory_space<vmem>>, vector<8x32xf32>
    tpu.vector_store %arg8[%c48_70, %c0_71], %181 {strides = array<i32>} : memref<64x64xf32, #tpu.memory_space<vmem>>, vector<8x32xf32>,
    %183 = vector.extract_strided_slice %180 {offsets = [0, 32], sizes = [8, 32], strides = [1, 1]} : vector<8x64xf32> to vector<8x32xf32>
    %c8_72 = arith.constant 8 : index
    %c32_73 = arith.constant 32 : index
    %184 = vector.load %arg8[%c8_72, %c32_73] : memref<64x64xf32, #tpu.memory_space<vmem>>, vector<8x32xf32>
    tpu.vector_store %arg8[%c8_72, %c32_73], %183 {strides = array<i32>} : memref<64x64xf32, #tpu.memory_space<vmem>>, vector<8x32xf32>,
    %cst_74 = arith.constant dense<0.000000e+00> : vector<8x256xf32>
    %185 = tpu.matmul %180, %7, %cst_74 {dimension_numbers = #tpu.dot_dimension_numbers<[1], [0], [0], [1], [0, 0, 1, 1], [], []>} : vector<8x64xf32>, vector<64x256xf32>, vector<8x256xf32> -> vector<8x256xf32>
    %c56_75 = arith.constant 56 : index
    %c0_76 = arith.constant 0 : index
    %186 = vector.load %arg7[%c56_75, %c0_76] : memref<64x256xf32, #tpu.memory_space<vmem>>, vector<8x256xf32>
    %187 = arith.addf %185, %186 : vector<8x256xf32>
    %188 = arith.negf %187 : vector<8x256xf32>
    %189 = math.exp %188 : vector<8x256xf32>
    %cst_77 = arith.constant 1.000000e+00 : f32
    %190 = vector.broadcast %cst_77 : f32 to vector<8x256xf32>
    %191 = arith.addf %190, %189 : vector<8x256xf32>
    %192 = arith.divf %190, %191 : vector<8x256xf32>
    %193 = vector.extract_strided_slice %192 {offsets = [0, 0], sizes = [8, 64], strides = [1, 1]} : vector<8x256xf32> to vector<8x64xf32>
    %194 = vector.extract_strided_slice %192 {offsets = [0, 64], sizes = [8, 64], strides = [1, 1]} : vector<8x256xf32> to vector<8x64xf32>
    %195 = vector.extract_strided_slice %192 {offsets = [0, 128], sizes = [8, 64], strides = [1, 1]} : vector<8x256xf32> to vector<8x64xf32>
    %cst_78 = arith.constant 2.000000e+00 : f32
    %196 = vector.broadcast %cst_78 : f32 to vector<8x64xf32>
    %197 = arith.mulf %196, %195 : vector<8x64xf32>
    %cst_79 = arith.constant 1.000000e+00 : f32
    %198 = vector.broadcast %cst_79 : f32 to vector<8x64xf32>
    %199 = arith.subf %197, %198 : vector<8x64xf32>
    %200 = vector.extract_strided_slice %192 {offsets = [0, 192], sizes = [8, 64], strides = [1, 1]} : vector<8x256xf32> to vector<8x64xf32>
    %201 = arith.mulf %194, %178 : vector<8x64xf32>
    %202 = arith.mulf %193, %199 : vector<8x64xf32>
    %203 = arith.addf %201, %202 : vector<8x64xf32>
    %204 = math.tanh %203 : vector<8x64xf32>
    %205 = arith.mulf %200, %204 : vector<8x64xf32>
    %206 = vector.extract_strided_slice %205 {offsets = [0, 0], sizes = [8, 32], strides = [1, 1]} : vector<8x64xf32> to vector<8x32xf32>
    %c56_80 = arith.constant 56 : index
    %c0_81 = arith.constant 0 : index
    %207 = vector.load %arg8[%c56_80, %c0_81] : memref<64x64xf32, #tpu.memory_space<vmem>>, vector<8x32xf32>
    tpu.vector_store %arg8[%c56_80, %c0_81], %206 {strides = array<i32>} : memref<64x64xf32, #tpu.memory_space<vmem>>, vector<8x32xf32>,
    %208 = vector.extract_strided_slice %205 {offsets = [0, 32], sizes = [8, 32], strides = [1, 1]} : vector<8x64xf32> to vector<8x32xf32>
    %c0_82 = arith.constant 0 : index
    %c32_83 = arith.constant 32 : index
    %209 = vector.load %arg8[%c0_82, %c32_83] : memref<64x64xf32, #tpu.memory_space<vmem>>, vector<8x32xf32>
    tpu.vector_store %arg8[%c0_82, %c32_83], %208 {strides = array<i32>} : memref<64x64xf32, #tpu.memory_space<vmem>>, vector<8x32xf32>,
    %c0_84 = arith.constant 0 : index
    %c0_85 = arith.constant 0 : index
    %210 = vector.load %arg8[%c0_84, %c0_85] : memref<64x64xf32, #tpu.memory_space<vmem>>, vector<64x64xf32>
    %c0_86 = arith.constant 0 : index
    %c0_87 = arith.constant 0 : index
    %211 = vector.load %arg4[%c0_86, %c0_87] : memref<64x128xf32, #tpu.memory_space<vmem>>, vector<64x128xf32>
    %cst_88 = arith.constant dense<0.000000e+00> : vector<64x128xf32>
    %212 = tpu.matmul %210, %211, %cst_88 {dimension_numbers = #tpu.dot_dimension_numbers<[1], [0], [0], [1], [0, 0, 1, 1], [], []>} : vector<64x64xf32>, vector<64x128xf32>, vector<64x128xf32> -> vector<64x128xf32>
    %c0_89 = arith.constant 0 : index
    %c0_90 = arith.constant 0 : index
    %213 = vector.load %arg5[%c0_89, %c0_90] : memref<1x128xf32, #tpu.memory_space<vmem>>, vector<1x128xf32>
    %214 = vector.broadcast %213 : vector<1x128xf32> to vector<64x128xf32>
    %215 = arith.addf %212, %214 : vector<64x128xf32>
    %c0_91 = arith.constant 0 : index
    %c0_92 = arith.constant 0 : index
    %216 = vector.load %arg6[%c0_91, %c0_92] : memref<64x128xf32, #tpu.memory_space<vmem>>, vector<64x128xf32>
    tpu.vector_store %arg6[%c0_91, %c0_92], %215 {strides = array<i32>} : memref<64x128xf32, #tpu.memory_space<vmem>>, vector<64x128xf32>,
    return
  }
}

</mosaic_0001>

<bundles_post_ra>
// kernel: rnn_forward.1
= control target key start
LH: loop header
LB: loop body
LE: loop exit
PB: predicated region body
PF: predicated region fallthrough
CT: control target
= control target key end

     0   :  { %v1578_v3 = vmov 0.0   ;;  %vm51_vm0 = vcmask 261120   ;;  %v41_v51 = vlaneseq  ;;  %vm326_vm1 = vcmask 523520   ;;  %s1973_s1 = inlined_call_operand.vmem [shape: f32[32,256], index: 1, kind: input, shape index: {}]   ;;  %s1974_s2 = inlined_call_operand.vmem [shape: f32[64,256], index: 2, kind: input, shape index: {}]   ;;  %s1975_s0 = inlined_call_operand.vmem [shape: f32[64,32], index: 0, kind: input, shape index: {}]   ;;  %s1976_s3 = inlined_call_operand.vmem [shape: f32[1,256], index: 3, kind: input, shape index: {}]   ;;  %s1977_s4 = inlined_call_operand.vmem [shape: f32[64,128], index: 4, kind: input, shape index: {}]   ;;  %s1978_s5 = inlined_call_operand.vmem [shape: f32[1,128], index: 5, kind: input, shape index: {}]   ;;  %s1979_s6 = inlined_call_operand.vmem [shape: f32[64,128], index: 6, kind: output, shape index: {}]  }
   0x1   :  { %v32_v0 = vld [vmem:[%s1973_s1 + $0x8] sm:$0xff]  ;;  %v34_v1 = vld [vmem:[%s1973_s1 + $0x18] sm:$0xff]  ;;  %v31_v2 = vld [vmem:[%s1973_s1] sm:$0xff]  ;;  %140 = vmatprep.mubr.f32.mxu1 %v1578_v3  ;;  %500 = vmatprep.mubr.f32.mxu0 %v1578_v3  ;;  %vm223_vm2 = vcmask 523264  }
   0x2   :  { %v1312_v4 = vpack.c.bf16 %v34_v1, %v32_v0  ;;  %v33_v5 = vld [vmem:[%s1973_s1 + $0x10] sm:$0xff]  ;;  %v36_v6 = vld [vmem:[%s1973_s1 + $0x28] sm:$0xff]  ;;  %v38_v7 = vld [vmem:[%s1973_s1 + $0x38] sm:$0xff]  ;;  %v42_v54 = vshrl.u32 %v41_v51, 7 }
   0x3   :  { %v1314_v8 = vpack.c.bf16 %v33_v5, %v31_v2  ;;  %v1316_v9 = vpack.c.bf16 %v38_v7, %v36_v6  ;;  %v35_v10 = vld [vmem:[%s1973_s1 + $0x20] sm:$0xff]  ;;  %v37_v11 = vld [vmem:[%s1973_s1 + $0x30] sm:$0xff]  ;;  %v206_v12 = vld [vmem:[%s1974_s2 + $0x8] sm:$0xff] }
   0x4   :  { %1313 = vmatprep.subr.bf16.mxu1 %v1312_v4  ;;  %v208_v13 = vld [vmem:[%s1974_s2 + $0x18] sm:$0xff]  ;;  %v205_v14 = vld [vmem:[%s1974_s2] sm:$0xff]  ;;  %v1318_v15 = vpack.c.bf16 %v37_v11, %v35_v10  ;;  %v207_v17 = vld [vmem:[%s1974_s2 + $0x10] sm:$0xff]  ;;  %v43_v57 = vsub.s32 0, %v42_v54  ;;  %v47_v59 = vsub.s32 1, %v42_v54 }
   0x5   :  { %1315 = vmatpush1.bf16.msra.mxu1 %v1314_v8  ;;  %v1650_v16 = vpack.c.bf16 %v208_v13, %v206_v12  ;;  %v1655_v18 = vpack.c.bf16 %v207_v17, %v205_v14  ;;  %v210_v19 = vld [vmem:[%s1974_s2 + $0x28] sm:$0xff]  ;;  %v212_v20 = vld [vmem:[%s1974_s2 + $0x38] sm:$0xff]  ;;  %v209_v22 = vld [vmem:[%s1974_s2 + $0x20] sm:$0xff] }
   0x6   :  { %1317 = vmatprep.subr.bf16.mxu1 %v1316_v9  ;;  %v1663_v21 = vpack.c.bf16 %v212_v20, %v210_v19  ;;  %v211_v23 = vld [vmem:[%s1974_s2 + $0x30] sm:$0xff]  ;;  %v23_v24 = vld [vmem:[%s1975_s0] sm:$0xff]  ;;  %v214_v25 = vld [vmem:[%s1974_s2 + $0x48] sm:$0xff] }
   0x7   :  { %1353 = vmatprep.subr.bf16.mxu0 %v1650_v16  ;;  %v216_v26 = vld [vmem:[%s1974_s2 + $0x58] sm:$0xff]  ;;  %v1684_v27 = vpack.c.bf16 %v211_v23, %v209_v22  ;;  %v213_v28 = vld [vmem:[%s1974_s2 + $0x40] sm:$0xff]  ;;  %v215_v29 = vld [vmem:[%s1974_s2 + $0x50] sm:$0xff] }
   0x8   :  { %1355 = vmatpush1.bf16.msra.mxu0 %v1655_v18  ;;  %v1693_v30 = vpack.c.bf16 %v216_v26, %v214_v25  ;;  %v24_v31 = vld [vmem:[%s1975_s0 + $0x8] sm:$0xff]  ;;  %v220_v33 = vld [vmem:[%s1974_s2 + $0x78] sm:$0xff]  ;;  %v1708_v34 = vpack.c.bf16 %v215_v29, %v213_v28  ;;  %v217_v35 = vld [vmem:[%s1974_s2 + $0x60] sm:$0xff] }
   0x9   :  { %1319 = vmatpush1.bf16.msra.mxu1 %v1318_v15  ;;  %1357 = vmatprep.subr.bf16.mxu0 %v1663_v21  ;;  %v218_v32 = vld [vmem:[%s1974_s2 + $0x68] sm:$0xff]  ;;  %v219_v36 = vld [vmem:[%s1974_s2 + $0x70] sm:$0xff]  ;;  %v26_v40 = vld [vmem:[%s1975_s0 + $0x18] sm:$0xff] }
   0xa   :  { %1321 = vmatprep.subr.bf16.mxu1 %v1650_v16  ;;  %v1718_v37 = vpack.c.bf16 %v220_v33, %v218_v32  ;;  %v25_v38 = vld [vmem:[%s1975_s0 + $0x10] sm:$0xff]  ;;  %v1727_v39 = vpack.c.bf16 %v219_v36, %v217_v35  ;;  %v27_v41 = vld [vmem:[%s1975_s0 + $0x20] sm:$0xff]  ;;  %v28_v42 = vld [vmem:[%s1975_s0 + $0x28] sm:$0xff] }
   0xb   :  { %v29_v43 = vld [vmem:[%s1975_s0 + $0x30] sm:$0xff]  ;;  %v30_v44 = vld [vmem:[%s1975_s0 + $0x38] sm:$0xff]  ;;  %v39_v58 = vld [vmem:[%s1976_s3] sm:$0x3]  ;;  %s1579_s3 = smov 64  }
   0xc   :  { %1220 = vmatmul.mubr.msk.f32.vlgmr.msra.gmra.mrb[0].mxu1 %vm51_vm0, %v23_v24  ;;  %1359 = vmatpush1.bf16.msra.mxu0 %v1684_v27  ;;  %v1799_v62 = vrot.slane %v39_v58, %v43_v57  ;;  %v1801_v63 = vrot.slane %v39_v58, %v47_v59 }
   0xd   :  { %1323 = vmatpush1.bf16.msra.mxu1 %v1655_v18  ;;  %146 = vmatprep.mubr.f32.mxu1 %v1578_v3 }
   0xe   :  { %1325 = vmatprep.subr.bf16.mxu1 %v1663_v21  ;;  %1361 = vmatprep.subr.bf16.mxu0 %v1693_v30 }
  0x10   :  { %1221 = vmatmul.mubr.msk.f32.gmra.mrb[2].mxu1 %vm51_vm0, %v24_v31  ;;  %1363 = vmatpush1.bf16.msra.mxu0 %v1708_v34 }
  0x11   :  { %152 = vmatprep.mubr.f32.mxu1 %v1578_v3  ;;  %1327 = vmatpush1.bf16.msra.mxu1 %v1684_v27 }
  0x12   :  { %1329 = vmatprep.subr.bf16.mxu1 %v1693_v30  ;;  %1365 = vmatprep.subr.bf16.mxu0 %v1718_v37 }
  0x14   :  { %1222 = vmatmul.mubr.msk.f32.gmra.mrb[4].mxu1 %vm51_vm0, %v25_v38  ;;  %1367 = vmatpush1.bf16.msra.mxu0 %v1727_v39 }
  0x15   :  { %158 = vmatprep.mubr.f32.mxu1 %v1578_v3  ;;  %1331 = vmatpush1.bf16.msra.mxu1 %v1708_v34 }
  0x16   :  { %1333 = vmatprep.subr.bf16.mxu1 %v1718_v37  ;;  %1369 = vmatprep.subr.bf16.mxu0 %v1650_v16 }
  0x18   :  { %1223 = vmatmul.mubr.msk.f32.gmra.mrb[6].mxu1 %vm51_vm0, %v26_v40 }
  0x19   :  { %164 = vmatprep.mubr.f32.mxu1 %v1578_v3  ;;  %1335 = vmatpush1.bf16.msra.mxu1 %v1727_v39 }
  0x1a   :  { %1337 = vmatprep.subr.bf16.mxu1 %v1650_v16 }
  0x1c   :  { %1224 = vmatmul.mubr.msk.f32.gmra.mrb[8].mxu1 %vm51_vm0, %v27_v41 }
  0x1d   :  { %170 = vmatprep.mubr.f32.mxu1 %v1578_v3 }
  0x20   :  { %1225 = vmatmul.mubr.msk.f32.gmra.mrb[10].mxu1 %vm51_vm0, %v28_v42 }
  0x21   :  { %176 = vmatprep.mubr.f32.mxu1 %v1578_v3 }
  0x24   :  { %1226 = vmatmul.mubr.msk.f32.gmra.mrb[12].mxu1 %vm51_vm0, %v29_v43 }
  0x25   :  { %182 = vmatprep.mubr.f32.mxu1 %v1578_v3 }
  0x28   :  { %1227 = vmatmul.mubr.msk.f32.gmra.mrb[14].mxu1 %vm51_vm0, %v30_v44 }
  0x29   :  { %291 = vmatprep.mubr.f32.mxu1 %v1578_v3 }
  0x2c   :  { %292 = vmatmul.mubr.f32.vlgmr.msra.gmra.mrb[0].mxu1 %v1578_v3 }
  0x2d   :  { %1339 = vmatpush1.bf16.msra.mxu1 %v1655_v18  ;;  %396 = vmatprep.mubr.f32.mxu1 %v1578_v3 }
  0x2e   :  { %1341 = vmatprep.subr.bf16.mxu1 %v1663_v21 }
  0x31   :  { %1343 = vmatpush1.bf16.msra.mxu1 %v1684_v27 }
  0x32   :  { %1345 = vmatprep.subr.bf16.mxu1 %v1693_v30 }
  0x35   :  { %1347 = vmatpush1.bf16.msra.mxu1 %v1708_v34 }
  0x36   :  { %1349 = vmatprep.subr.bf16.mxu1 %v1718_v37 }
  0x39   :  { %1351 = vmatpush1.bf16.msra.mxu1 %v1727_v39 }
  0xe7   :  { %v1772_v45 = vpop.f32.mrb[4].mxu1 }
  0xe8   :  { %v1774_v46 = vpop.f32.mrb[5].mxu1 }
  0xeb   :  { %v1776_v47 = vpop.f32.mrb[6].mxu1 }
  0xec   :  { %v1778_v48 = vpop.f32.mrb[7].mxu1 }
  0xef   :  { %v1780_v49 = vpop.f32.mrb[8].mxu1 }
  0xf0   :  { %v1782_v50 = vpop.f32.mrb[9].mxu1 }
  0xf3   :  { %v1784_v52 = vpop.f32.mrb[10].mxu1 }
  0xf4   :  { %v1786_v53 = vpop.f32.mrb[11].mxu1 }
  0xf7   :  { %v1788_v55 = vpop.f32.mrb[12].mxu1 }
  0xf8   :  { %v1790_v56 = vpop.f32.mrb[13].mxu1 }
  0xfb   :  { %v1795_v60 = vpop.f32.mrb[14].mxu1 }
  0xfc   :  { %v1797_v61 = vpop.f32.mrb[15].mxu1 }
  0xff   :  { %v293_v0 = vpop.f32.mrb[0].mxu1 }
 0x100   :  { %v1464_v1 = vadd.f32 %v293_v0, %v1799_v62  ;;  %v295_v2 = vpop.f32.mrb[1].mxu1 }
 0x101   :  { %v1465_v4 = vadd.f32 %v295_v2, %v1801_v63  ;;  %v157_v2 = vadd.f32 %v1774_v46, %v1801_v63 }
 0x102   :  { %v1228_v5 = vmul.f32 -1.442695, %v1464_v1  ;;  %v155_v1 = vadd.f32 %v1772_v45, %v1799_v62 }
 0x103   :  { %v1229_v6 = vmul.f32 -1.442695, %v1465_v4 }
 0x104   :  { %1498 = vpow2.f32 %v1228_v5 }
 0x105   :  { %1500 = vpow2.f32 %v1229_v6 }
 0x10e   :  { %v1499_v7 = vpop.eup %1498 }
 0x10f   :  { %v1501_v8 = vpop.eup %1500  ;;  %v304_v10 = vadd.f32 1.0, %v1499_v7 }
 0x110   :  { %v305_v9 = vadd.f32 1.0, %v1501_v8 }
 0x112   :  { %1502 = vrcp.f32 %v305_v9 }
 0x113   :  { %1504 = vrcp.f32 %v304_v10 }
 0x11c   :  { %v1503_v11 = vpop.eup %1502 }
 0x11d   :  { %v310_v12 = vmul.f32 2.0, %v1503_v11  ;;  %v1505_v14 = vpop.eup %1504 }
 0x11e   :  { %v312_v17 = vmul.f32 0.0, %v1505_v14 }
 0x11f   :  { %v1230_v13 = vadd.f32 -1.0, %v310_v12 }
 0x121   :  { %v313_v15 = vmul.f32 %v1505_v14, %v1230_v13 }
 0x123   :  { %315 = vrot.lane.b32.xlu0 %v313_v15, %s1579_s3 }
 0x195   :  { %v316_v19 = vpop.permute.xlu0 %315 }
 0x196   :  { %v318_v20 = vadd.f32 %v316_v19, %v312_v17 }
 0x198   :  { %1506 = vtanh.f32 %v318_v20 }
 0x1a2   :  { %v1507_v22 = vpop.eup %1506 }
 0x1a3   :  { %v320_v23 = vmul.f32 %v1507_v22, %v1503_v11 }
 0x1a5   :  { %322 = vrot.lane.b32.xlu0 %v320_v23, %s1579_s3 }
 0x217   :  { %v323_v24 = vpop.permute.xlu0 %322 }
 0x218   :  { %325 = vst.msk [vmem:[#allocation3] sm:$0xff] %vm51_vm0, %v323_v24  ;;  %1231 = vmatmul.mubr.msk.f32.vlgmr.msra.gmra.mrb[2].mxu1 %vm223_vm2, %v323_v24 }
 0x219   :  { %327 = vst.msk [vmem:[#allocation3 + $0x38] sm:$0xff] %vm326_vm1, %v323_v24 }
 0x2eb   :  { %v398_v25 = vpop.f32.mrb[2].mxu1 }
 0x2ec   :  { %v1466_v26 = vadd.f32 %v398_v25, %v1799_v62  ;;  %v400_v28 = vpop.f32.mrb[3].mxu1 }
 0x2ed   :  { %v1467_v29 = vadd.f32 %v400_v28, %v1801_v63  ;;  %v163_v28 = vadd.f32 %v1778_v48, %v1801_v63 }
 0x2ee   :  { %v1232_v31 = vmul.f32 -1.442695, %v1466_v26  ;;  %v161_v26 = vadd.f32 %v1776_v47, %v1799_v62 }
 0x2ef   :  { %v1233_v32 = vmul.f32 -1.442695, %v1467_v29 }
 0x2f0   :  { %1508 = vpow2.f32 %v1232_v31 }
 0x2f1   :  { %1510 = vpow2.f32 %v1233_v32 }
 0x2fa   :  { %v1509_v33 = vpop.eup %1508 }
 0x2fb   :  { %v1511_v35 = vpop.eup %1510  ;;  %v409_v38 = vadd.f32 1.0, %v1509_v33 }
 0x2fc   :  { %v410_v36 = vadd.f32 1.0, %v1511_v35 }
 0x2fe   :  { %1512 = vrcp.f32 %v410_v36 }
 0x2ff   :  { %1514 = vrcp.f32 %v409_v38 }
 0x308   :  { %v1513_v40 = vpop.eup %1512 }
 0x309   :  { %v415_v41 = vmul.f32 2.0, %v1513_v40  ;;  %v1515_v43 = vpop.eup %1514 }
 0x30a   :  { %v417_v51 = vmul.f32 %v1515_v43, %v318_v20 }
 0x30b   :  { %v1234_v42 = vadd.f32 -1.0, %v415_v41 }
 0x30d   :  { %v418_v44 = vmul.f32 %v1515_v43, %v1234_v42 }
 0x30f   :  { %420 = vrot.lane.b32.xlu1 %v418_v44, %s1579_s3 }
 0x381   :  { %v421_v54 = vpop.permute.xlu1 %420 }
 0x382   :  { %v423_v57 = vadd.f32 %v421_v54, %v417_v51 }
 0x384   :  { %1516 = vtanh.f32 %v423_v57 }
 0x38e   :  { %v1517_v58 = vpop.eup %1516 }
 0x38f   :  { %v425_v59 = vmul.f32 %v1517_v58, %v1513_v40 }
 0x391   :  { %427 = vrot.lane.b32.xlu1 %v425_v59, %s1579_s3 }
 0x403   :  { %v428_v0 = vpop.permute.xlu1 %427 }
 0x404   :  { %430 = vst.msk [vmem:[#allocation3 + $0x8] sm:$0xff] %vm51_vm0, %v428_v0  ;;  %1235 = vmatmul.mubr.msk.f32.vlgmr.msra.gmra.mrb[0].mxu0 %vm223_vm2, %v428_v0 }
 0x405   :  { %431 = vst.msk [vmem:[#allocation3 + $0x30] sm:$0xff] %vm326_vm1, %v428_v0  ;;  %1371 = vmatpush1.bf16.msra.mxu0 %v1655_v18  ;;  %604 = vmatprep.mubr.f32.mxu0 %v1578_v3 }
 0x406   :  { %1373 = vmatprep.subr.bf16.mxu0 %v1663_v21 }
 0x409   :  { %1375 = vmatpush1.bf16.msra.mxu0 %v1684_v27 }
 0x40a   :  { %1377 = vmatprep.subr.bf16.mxu0 %v1693_v30 }
 0x40d   :  { %1379 = vmatpush1.bf16.msra.mxu0 %v1708_v34 }
 0x40e   :  { %1381 = vmatprep.subr.bf16.mxu0 %v1718_v37 }
 0x411   :  { %1383 = vmatpush1.bf16.msra.mxu0 %v1727_v39 }
 0x412   :  { %1385 = vmatprep.subr.bf16.mxu0 %v1650_v16 }
 0x4d7   :  { %v502_v4 = vpop.f32.mrb[0].mxu0 }
 0x4d8   :  { %v503_v5 = vadd.f32 %v502_v4, %v155_v1  ;;  %v504_v6 = vpop.f32.mrb[1].mxu0  ;;  %v169_v4 = vadd.f32 %v1782_v50, %v1801_v63 }
 0x4d9   :  { %v505_v7 = vadd.f32 %v504_v6, %v157_v2  ;;  %v167_v2 = vadd.f32 %v1780_v49, %v1799_v62 }
 0x4da   :  { %v1236_v8 = vmul.f32 -1.442695, %v503_v5 }
 0x4db   :  { %v1237_v9 = vmul.f32 -1.442695, %v505_v7 }
 0x4dc   :  { %1518 = vpow2.f32 %v1236_v8 }
 0x4dd   :  { %1520 = vpow2.f32 %v1237_v9 }
 0x4e6   :  { %v1519_v10 = vpop.eup %1518 }
 0x4e7   :  { %v1521_v11 = vpop.eup %1520  ;;  %v513_v13 = vadd.f32 1.0, %v1519_v10 }
 0x4e8   :  { %v514_v12 = vadd.f32 1.0, %v1521_v11 }
 0x4ea   :  { %1522 = vrcp.f32 %v514_v12 }
 0x4eb   :  { %1524 = vrcp.f32 %v513_v13 }
 0x4f4   :  { %v1523_v14 = vpop.eup %1522 }
 0x4f5   :  { %v519_v15 = vmul.f32 2.0, %v1523_v14  ;;  %v1525_v17 = vpop.eup %1524 }
 0x4f6   :  { %v521_v46 = vmul.f32 %v1525_v17, %v423_v57 }
 0x4f7   :  { %v1238_v45 = vadd.f32 -1.0, %v519_v15 }
 0x4f9   :  { %v522_v19 = vmul.f32 %v1525_v17, %v1238_v45 }
 0x4fb   :  { %524 = vrot.lane.b32.xlu0 %v522_v19, %s1579_s3 }
 0x56d   :  { %v525_v20 = vpop.permute.xlu0 %524 }
 0x56e   :  { %v527_v22 = vadd.f32 %v525_v20, %v521_v46 }
 0x570   :  { %1526 = vtanh.f32 %v527_v22 }
 0x57a   :  { %v1527_v23 = vpop.eup %1526 }
 0x57b   :  { %v529_v24 = vmul.f32 %v1527_v23, %v1523_v14 }
 0x57d   :  { %531 = vrot.lane.b32.xlu1 %v529_v24, %s1579_s3 }
 0x5ef   :  { %v532_v25 = vpop.permute.xlu1 %531 }
 0x5f0   :  { %534 = vst.msk [vmem:[#allocation3 + $0x10] sm:$0xff] %vm51_vm0, %v532_v25  ;;  %1239 = vmatmul.mubr.msk.f32.vlgmr.msra.gmra.mrb[2].mxu0 %vm223_vm2, %v532_v25 }
 0x5f1   :  { %535 = vst.msk [vmem:[#allocation3 + $0x28] sm:$0xff] %vm326_vm1, %v532_v25  ;;  %1387 = vmatpush1.bf16.msra.mxu0 %v1655_v18  ;;  %708 = vmatprep.mubr.f32.mxu0 %v1578_v3  ;;  %v173_v25 = vadd.f32 %v1784_v52, %v1799_v62 }
 0x5f2   :  { %1389 = vmatprep.subr.bf16.mxu0 %v1663_v21 }
 0x5f5   :  { %1391 = vmatpush1.bf16.msra.mxu0 %v1684_v27 }
 0x5f6   :  { %1393 = vmatprep.subr.bf16.mxu0 %v1693_v30 }
 0x5f9   :  { %1395 = vmatpush1.bf16.msra.mxu0 %v1708_v34 }
 0x5fa   :  { %1397 = vmatprep.subr.bf16.mxu0 %v1718_v37 }
 0x5fd   :  { %1399 = vmatpush1.bf16.msra.mxu0 %v1727_v39 }
 0x5fe   :  { %1401 = vmatprep.subr.bf16.mxu0 %v1650_v16 }
 0x6c3   :  { %v606_v29 = vpop.f32.mrb[2].mxu0 }
 0x6c4   :  { %v607_v31 = vadd.f32 %v606_v29, %v161_v26  ;;  %v608_v32 = vpop.f32.mrb[3].mxu0  ;;  %v175_v26 = vadd.f32 %v1786_v53, %v1801_v63 }
 0x6c5   :  { %v609_v33 = vadd.f32 %v608_v32, %v163_v28 }
 0x6c6   :  { %v1240_v35 = vmul.f32 -1.442695, %v607_v31 }
 0x6c7   :  { %v1241_v36 = vmul.f32 -1.442695, %v609_v33 }
 0x6c8   :  { %1528 = vpow2.f32 %v1240_v35 }
 0x6c9   :  { %1530 = vpow2.f32 %v1241_v36 }
 0x6d2   :  { %v1529_v38 = vpop.eup %1528 }
 0x6d3   :  { %v1531_v40 = vpop.eup %1530  ;;  %v617_v42 = vadd.f32 1.0, %v1529_v38 }
 0x6d4   :  { %v618_v41 = vadd.f32 1.0, %v1531_v40 }
 0x6d6   :  { %1532 = vrcp.f32 %v618_v41 }
 0x6d7   :  { %1534 = vrcp.f32 %v617_v42 }
 0x6e0   :  { %v1533_v43 = vpop.eup %1532 }
 0x6e1   :  { %v623_v44 = vmul.f32 2.0, %v1533_v43  ;;  %v1535_v51 = vpop.eup %1534 }
 0x6e2   :  { %v625_v48 = vmul.f32 %v1535_v51, %v527_v22 }
 0x6e3   :  { %v1242_v47 = vadd.f32 -1.0, %v623_v44 }
 0x6e5   :  { %v626_v54 = vmul.f32 %v1535_v51, %v1242_v47 }
 0x6e7   :  { %628 = vrot.lane.b32.xlu0 %v626_v54, %s1579_s3 }
 0x759   :  { %v629_v57 = vpop.permute.xlu0 %628 }
 0x75a   :  { %v631_v58 = vadd.f32 %v629_v57, %v625_v48 }
 0x75c   :  { %1536 = vtanh.f32 %v631_v58 }
 0x766   :  { %v1537_v59 = vpop.eup %1536 }
 0x767   :  { %v633_v0 = vmul.f32 %v1537_v59, %v1533_v43 }
 0x769   :  { %635 = vrot.lane.b32.xlu1 %v633_v0, %s1579_s3 }
 0x7db   :  { %v636_v1 = vpop.permute.xlu1 %635 }
 0x7dc   :  { %638 = vst.msk [vmem:[#allocation3 + $0x18] sm:$0xff] %vm51_vm0, %v636_v1  ;;  %1243 = vmatmul.mubr.msk.f32.vlgmr.msra.gmra.mrb[4].mxu0 %vm223_vm2, %v636_v1 }
 0x7dd   :  { %639 = vst.msk [vmem:[#allocation3 + $0x20] sm:$0xff] %vm326_vm1, %v636_v1  ;;  %1403 = vmatpush1.bf16.msra.mxu0 %v1655_v18  ;;  %812 = vmatprep.mubr.f32.mxu0 %v1578_v3 }
 0x7de   :  { %1405 = vmatprep.subr.bf16.mxu0 %v1663_v21 }
 0x7e1   :  { %1407 = vmatpush1.bf16.msra.mxu0 %v1684_v27 }
 0x7e2   :  { %1409 = vmatprep.subr.bf16.mxu0 %v1693_v30 }
 0x7e5   :  { %1411 = vmatpush1.bf16.msra.mxu0 %v1708_v34 }
 0x7e6   :  { %1413 = vmatprep.subr.bf16.mxu0 %v1718_v37 }
 0x7e9   :  { %1415 = vmatpush1.bf16.msra.mxu0 %v1727_v39 }
 0x7ea   :  { %1417 = vmatprep.subr.bf16.mxu0 %v1650_v16 }
 0x8af   :  { %v710_v5 = vpop.f32.mrb[4].mxu0 }
 0x8b0   :  { %v711_v6 = vadd.f32 %v710_v5, %v167_v2  ;;  %v712_v7 = vpop.f32.mrb[5].mxu0 }
 0x8b1   :  { %v713_v8 = vadd.f32 %v712_v7, %v169_v4 }
 0x8b2   :  { %v1244_v9 = vmul.f32 -1.442695, %v711_v6 }
 0x8b3   :  { %v1245_v10 = vmul.f32 -1.442695, %v713_v8 }
 0x8b4   :  { %1538 = vpow2.f32 %v1244_v9 }
 0x8b5   :  { %1540 = vpow2.f32 %v1245_v10 }
 0x8be   :  { %v1539_v11 = vpop.eup %1538 }
 0x8bf   :  { %v1541_v12 = vpop.eup %1540  ;;  %v721_v14 = vadd.f32 1.0, %v1539_v11 }
 0x8c0   :  { %v722_v13 = vadd.f32 1.0, %v1541_v12  ;;  %v185_v12 = vadd.f32 %v1795_v60, %v1799_v62 }
 0x8c2   :  { %1542 = vrcp.f32 %v722_v13  ;;  %v187_v13 = vadd.f32 %v1797_v61, %v1801_v63  ;;  %v1064_v61 = vld [vmem:[%s1977_s4] sm:$0xff] }
 0x8c3   :  { %1544 = vrcp.f32 %v721_v14 }
 0x8cc   :  { %v1543_v15 = vpop.eup %1542 }
 0x8cd   :  { %v727_v45 = vmul.f32 2.0, %v1543_v15  ;;  %v1545_v17 = vpop.eup %1544 }
 0x8ce   :  { %v729_v50 = vmul.f32 %v1545_v17, %v631_v58  ;;  %v179_v58 = vadd.f32 %v1788_v55, %v1799_v62 }
 0x8cf   :  { %v1246_v49 = vadd.f32 -1.0, %v727_v45 }
 0x8d1   :  { %v730_v19 = vmul.f32 %v1545_v17, %v1246_v49 }
 0x8d3   :  { %732 = vrot.lane.b32.xlu0 %v730_v19, %s1579_s3 }
 0x945   :  { %v733_v46 = vpop.permute.xlu0 %732 }
 0x946   :  { %v735_v20 = vadd.f32 %v733_v46, %v729_v50 }
 0x948   :  { %1546 = vtanh.f32 %v735_v20 }
 0x952   :  { %v1547_v22 = vpop.eup %1546 }
 0x953   :  { %v737_v23 = vmul.f32 %v1547_v22, %v1543_v15 }
 0x955   :  { %739 = vrot.lane.b32.xlu1 %v737_v23, %s1579_s3 }
 0x9c7   :  { %v740_v24 = vpop.permute.xlu1 %739 }
 0x9c8   :  { %742 = vst.msk [vmem:[#allocation3 + $0x20] sm:$0xff] %vm51_vm0, %v740_v24  ;;  %1247 = vmatmul.mubr.msk.f32.vlgmr.msra.gmra.mrb[6].mxu0 %vm223_vm2, %v740_v24 }
 0x9c9   :  { %743 = vst.msk [vmem:[#allocation3 + $0x18] sm:$0xff] %vm326_vm1, %v740_v24  ;;  %1419 = vmatpush1.bf16.msra.mxu0 %v1655_v18  ;;  %916 = vmatprep.mubr.f32.mxu0 %v1578_v3 }
 0x9ca   :  { %1421 = vmatprep.subr.bf16.mxu0 %v1663_v21 }
 0x9cd   :  { %1423 = vmatpush1.bf16.msra.mxu0 %v1684_v27 }
 0x9ce   :  { %1425 = vmatprep.subr.bf16.mxu0 %v1693_v30 }
 0x9d1   :  { %1427 = vmatpush1.bf16.msra.mxu0 %v1708_v34 }
 0x9d2   :  { %1429 = vmatprep.subr.bf16.mxu0 %v1718_v37 }
 0x9d5   :  { %1431 = vmatpush1.bf16.msra.mxu0 %v1727_v39 }
 0x9d6   :  { %1433 = vmatprep.subr.bf16.mxu0 %v1650_v16 }
 0xa9b   :  { %v814_v28 = vpop.f32.mrb[6].mxu0 }
 0xa9c   :  { %v815_v29 = vadd.f32 %v814_v28, %v173_v25  ;;  %v816_v31 = vpop.f32.mrb[7].mxu0 }
 0xa9d   :  { %v817_v32 = vadd.f32 %v816_v31, %v175_v26  ;;  %v1066_v26 = vld [vmem:[%s1977_s4 + $0x10] sm:$0xff] }
 0xa9e   :  { %v1248_v33 = vmul.f32 -1.442695, %v815_v29  ;;  %v1067_v29 = vld [vmem:[%s1977_s4 + $0x18] sm:$0xff] }
 0xa9f   :  { %v1249_v35 = vmul.f32 -1.442695, %v817_v32  ;;  %v1452_v31 = vpack.c.bf16 %v1067_v29, %v1066_v26 }
 0xaa0   :  { %1548 = vpow2.f32 %v1248_v33 }
 0xaa1   :  { %1550 = vpow2.f32 %v1249_v35 }
 0xaaa   :  { %v1549_v36 = vpop.eup %1548 }
 0xaab   :  { %v1551_v38 = vpop.eup %1550  ;;  %v825_v41 = vadd.f32 1.0, %v1549_v36  ;;  %v1068_v36 = vld [vmem:[%s1977_s4 + $0x20] sm:$0xff] }
 0xaac   :  { %v826_v40 = vadd.f32 1.0, %v1551_v38  ;;  %v1069_v38 = vld [vmem:[%s1977_s4 + $0x28] sm:$0xff] }
 0xaae   :  { %1552 = vrcp.f32 %v826_v40  ;;  %v1456_v40 = vpack.c.bf16 %v1069_v38, %v1068_v36 }
 0xaaf   :  { %1554 = vrcp.f32 %v825_v41  ;;  %v1070_v41 = vld [vmem:[%s1977_s4 + $0x30] sm:$0xff] }
 0xab8   :  { %v1553_v16 = vpop.eup %1552 }
 0xab9   :  { %v831_v42 = vmul.f32 2.0, %v1553_v16  ;;  %v1555_v43 = vpop.eup %1554 }
 0xaba   :  { %v833_v53 = vmul.f32 %v1555_v43, %v735_v20 }
 0xabb   :  { %v1250_v52 = vadd.f32 -1.0, %v831_v42 }
 0xabd   :  { %v834_v44 = vmul.f32 %v1555_v43, %v1250_v52 }
 0xabf   :  { %836 = vrot.lane.b32.xlu0 %v834_v44, %s1579_s3 }
 0xb31   :  { %v837_v47 = vpop.permute.xlu0 %836 }
 0xb32   :  { %v839_v51 = vadd.f32 %v837_v47, %v833_v53 }
 0xb34   :  { %1556 = vtanh.f32 %v839_v51 }
 0xb3e   :  { %v1557_v54 = vpop.eup %1556 }
 0xb3f   :  { %v841_v48 = vmul.f32 %v1557_v54, %v1553_v16  ;;  %v1071_v16 = vld [vmem:[%s1977_s4 + $0x38] sm:$0xff] }
 0xb40   :  { %v1460_v42 = vpack.c.bf16 %v1071_v16, %v1070_v41  ;;  %v1059_v54 = vld [vmem:[#allocation3 + $0x18] sm:$0xff] }
 0xb41   :  { %843 = vrot.lane.b32.xlu1 %v841_v48, %s1579_s3  ;;  %v1060_v48 = vld [vmem:[#allocation3 + $0x20] sm:$0xff] }
 0xbb3   :  { %v844_v57 = vpop.permute.xlu1 %843 }
 0xbb4   :  { %846 = vst.msk [vmem:[#allocation3 + $0x28] sm:$0xff] %vm51_vm0, %v844_v57  ;;  %1251 = vmatmul.mubr.msk.f32.vlgmr.msra.gmra.mrb[8].mxu0 %vm223_vm2, %v844_v57 }
 0xbb5   :  { %847 = vst.msk [vmem:[#allocation3 + $0x10] sm:$0xff] %vm326_vm1, %v844_v57  ;;  %1435 = vmatpush1.bf16.msra.mxu0 %v1655_v18  ;;  %1020 = vmatprep.mubr.f32.mxu0 %v1578_v3  ;;  %v181_v18 = vadd.f32 %v1790_v56, %v1801_v63  ;;  %v1065_v63 = vld [vmem:[%s1977_s4 + $0x8] sm:$0xff] }
 0xbb6   :  { %1437 = vmatprep.subr.bf16.mxu0 %v1663_v21  ;;  %v1448_v28 = vpack.c.bf16 %v1065_v63, %v1064_v61 }
 0xbb8   :  { %1449 = vmatprep.subr.bf16.mxu1 %v1448_v28 }
 0xbb9   :  { %1439 = vmatpush1.bf16.msra.mxu0 %v1684_v27  ;;  %1451 = vmatpush3.bf16.msra.mxu1 %v1448_v28 }
 0xbba   :  { %1441 = vmatprep.subr.bf16.mxu0 %v1693_v30  ;;  %1453 = vmatprep.subr.bf16.mxu1 %v1452_v31 }
 0xbbb   :  { %v1061_v57 = vld [vmem:[#allocation3 + $0x28] sm:$0xff] }
 0xbbd   :  { %1443 = vmatpush1.bf16.msra.mxu0 %v1708_v34  ;;  %1455 = vmatpush3.bf16.msra.mxu1 %v1452_v31 }
 0xbbe   :  { %1445 = vmatprep.subr.bf16.mxu0 %v1718_v37  ;;  %1457 = vmatprep.subr.bf16.mxu1 %v1456_v40 }
 0xbc1   :  { %1447 = vmatpush1.bf16.msra.mxu0 %v1727_v39  ;;  %1459 = vmatpush3.bf16.msra.mxu1 %v1456_v40 }
 0xbc2   :  { %1461 = vmatprep.subr.bf16.mxu1 %v1460_v42 }
 0xbc5   :  { %1463 = vmatpush3.bf16.msra.mxu1 %v1460_v42 }
 0xc87   :  { %v918_v59 = vpop.f32.mrb[8].mxu0 }
 0xc88   :  { %v919_v3 = vadd.f32 %v918_v59, %v179_v58  ;;  %v920_v0 = vpop.f32.mrb[9].mxu0  ;;  %v1259_v59 = vld [vmem:[%s1978_s5] ss:$0 sm:$0xff] }
 0xc89   :  { %v921_v21 = vadd.f32 %v920_v0, %v181_v18 }
 0xc8a   :  { %v1252_v1 = vmul.f32 -1.442695, %v919_v3 }
 0xc8b   :  { %v1253_v27 = vmul.f32 -1.442695, %v921_v21 }
 0xc8c   :  { %1558 = vpow2.f32 %v1252_v1 }
 0xc8d   :  { %1560 = vpow2.f32 %v1253_v27 }
 0xc96   :  { %v1559_v30 = vpop.eup %1558 }
 0xc97   :  { %v1561_v34 = vpop.eup %1560  ;;  %v929_v37 = vadd.f32 1.0, %v1559_v30 }
 0xc98   :  { %v930_v2 = vadd.f32 1.0, %v1561_v34 }
 0xc9a   :  { %1562 = vrcp.f32 %v930_v2 }
 0xc9b   :  { %1564 = vrcp.f32 %v929_v37 }
 0xca4   :  { %v1563_v39 = vpop.eup %1562 }
 0xca5   :  { %v935_v4 = vmul.f32 2.0, %v1563_v39  ;;  %v1565_v5 = vpop.eup %1564 }
 0xca6   :  { %v937_v56 = vmul.f32 %v1565_v5, %v839_v51  ;;  %v1058_v51 = vld [vmem:[#allocation3 + $0x10] sm:$0xff] }
 0xca7   :  { %v1254_v55 = vadd.f32 -1.0, %v935_v4 }
 0xca9   :  { %v938_v6 = vmul.f32 %v1565_v5, %v1254_v55 }
 0xcab   :  { %940 = vrot.lane.b32.xlu0 %v938_v6, %s1579_s3 }
 0xd1d   :  { %v941_v7 = vpop.permute.xlu0 %940 }
 0xd1e   :  { %v943_v8 = vadd.f32 %v941_v7, %v937_v56 }
 0xd20   :  { %1566 = vtanh.f32 %v943_v8 }
 0xd2a   :  { %v1567_v9 = vpop.eup %1566 }
 0xd2b   :  { %v945_v10 = vmul.f32 %v1567_v9, %v1563_v39 }
 0xd2d   :  { %947 = vrot.lane.b32.xlu1 %v945_v10, %s1579_s3 }
 0xd9f   :  { %v948_v11 = vpop.permute.xlu1 %947 }
 0xda0   :  { %950 = vst.msk [vmem:[#allocation3 + $0x30] sm:$0xff] %vm51_vm0, %v948_v11  ;;  %1255 = vmatmul.mubr.msk.f32.vlgmr.msra.gmra.mrb[10].mxu0 %vm223_vm2, %v948_v11 }
 0xda1   :  { %951 = vst.msk [vmem:[#allocation3 + $0x8] sm:$0xff] %vm326_vm1, %v948_v11 }
 0xda7   :  { %v1062_v58 = vld [vmem:[#allocation3 + $0x30] sm:$0xff] }
 0xda8   :  { %v1057_v47 = vld [vmem:[#allocation3 + $0x8] sm:$0xff] }
 0xe73   :  { %v1022_v14 = vpop.f32.mrb[10].mxu0 }
 0xe74   :  { %v1023_v15 = vadd.f32 %v1022_v14, %v185_v12  ;;  %v1024_v45 = vpop.f32.mrb[11].mxu0 }
 0xe75   :  { %v1025_v49 = vadd.f32 %v1024_v45, %v187_v13 }
 0xe76   :  { %v1256_v17 = vmul.f32 -1.442695, %v1023_v15 }
 0xe77   :  { %v1257_v19 = vmul.f32 -1.442695, %v1025_v49 }
 0xe78   :  { %1568 = vpow2.f32 %v1256_v17 }
 0xe79   :  { %1570 = vpow2.f32 %v1257_v19 }
 0xe82   :  { %v1569_v50 = vpop.eup %1568 }
 0xe83   :  { %v1571_v46 = vpop.eup %1570  ;;  %v1033_v22 = vadd.f32 1.0, %v1569_v50 }
 0xe84   :  { %v1034_v20 = vadd.f32 1.0, %v1571_v46 }
 0xe86   :  { %1572 = vrcp.f32 %v1034_v20 }
 0xe87   :  { %1574 = vrcp.f32 %v1033_v22 }
 0xe90   :  { %v1573_v23 = vpop.eup %1572 }
 0xe91   :  { %v1039_v24 = vmul.f32 2.0, %v1573_v23  ;;  %v1575_v62 = vpop.eup %1574 }
 0xe92   :  { %v1041_v32 = vmul.f32 %v1575_v62, %v943_v8 }
 0xe93   :  { %v1258_v60 = vadd.f32 -1.0, %v1039_v24 }
 0xe95   :  { %v1042_v25 = vmul.f32 %v1575_v62, %v1258_v60 }
 0xe97   :  { %1044 = vrot.lane.b32.xlu0 %v1042_v25, %s1579_s3 }
 0xf09   :  { %v1045_v33 = vpop.permute.xlu0 %1044 }
 0xf0a   :  { %v1047_v35 = vadd.f32 %v1045_v33, %v1041_v32 }
 0xf0c   :  { %1576 = vtanh.f32 %v1047_v35 }
 0xf16   :  { %v1577_v52 = vpop.eup %1576 }
 0xf17   :  { %v1049_v43 = vmul.f32 %v1577_v52, %v1573_v23 }
 0xf19   :  { %1051 = vrot.lane.b32.xlu1 %v1049_v43, %s1579_s3 }
 0xf8b   :  { %v1052_v44 = vpop.permute.xlu1 %1051 }
 0xf8c   :  { %1054 = vst.msk [vmem:[#allocation3 + $0x38] sm:$0xff] %vm51_vm0, %v1052_v44 }
 0xf8d   :  { %1055 = vst.msk [vmem:[#allocation3] sm:$0xff] %vm326_vm1, %v1052_v44 }
 0xf93   :  { %v1063_v18 = vld [vmem:[#allocation3 + $0x38] sm:$0xff] }
 0xf94   :  { %v1056_v53 = vld [vmem:[#allocation3] sm:$0xff] }
 0xf95   :  { %1300 = vmatprep.mubr.msk.f32.mxu1 %vm223_vm2, %v1056_v53 }
 0xf96   :  { %1301 = vmatmul.mubr.msk.f32.vlgmr.msra.gmra.mrb[16].mxu1 %vm223_vm2, %v1057_v47 }
 0xf97   :  { %1303 = vmatprep.mubr.msk.f32.mxu1 %vm223_vm2, %v1058_v51 }
 0xf9a   :  { %1304 = vmatmul.mubr.msk.f32.gmra.mrb[18].mxu1 %vm223_vm2, %v1059_v54 }
 0xf9b   :  { %1306 = vmatprep.mubr.msk.f32.mxu1 %vm223_vm2, %v1060_v48 }
 0xf9e   :  { %1307 = vmatmul.mubr.msk.f32.gmra.mrb[20].mxu1 %vm223_vm2, %v1061_v57 }
 0xf9f   :  { %1309 = vmatprep.mubr.msk.f32.mxu1 %vm223_vm2, %v1062_v58 }
 0xfa2   :  { %1310 = vmatmul.mubr.msk.f32.gmra.mrb[22].mxu1 %vm223_vm2, %v1063_v18 }
0x1069   :  { %v1302_v3 = vpop.f32.mrb[16].mxu1 }
0x106a   :  { %v1175_v0 = vadd.f32 %v1302_v3, %v1259_v59  ;;  %v1169_v21 = vpop.f32.mrb[17].mxu1 }
0x106b   :  { %v1170_v1 = vadd.f32 %v1259_v59, %v1169_v21 }
0x106c   :  { %1209 = vst [vmem:[%s1979_s6 + $0x8] sm:$0xff] %v1175_v0 }
0x106d   :  { %1208 = vst [vmem:[%s1979_s6] sm:$0xff] %v1170_v1  ;;  %v1305_v27 = vpop.f32.mrb[18].mxu1 }
0x106e   :  { %v1185_v30 = vadd.f32 %v1305_v27, %v1259_v59  ;;  %v1179_v34 = vpop.f32.mrb[19].mxu1 }
0x106f   :  { %v1180_v2 = vadd.f32 %v1259_v59, %v1179_v34 }
0x1070   :  { %1211 = vst [vmem:[%s1979_s6 + $0x18] sm:$0xff] %v1185_v30 }
0x1071   :  { %1210 = vst [vmem:[%s1979_s6 + $0x10] sm:$0xff] %v1180_v2  ;;  %v1308_v37 = vpop.f32.mrb[20].mxu1 }
0x1072   :  { %v1195_v39 = vadd.f32 %v1308_v37, %v1259_v59  ;;  %v1189_v4 = vpop.f32.mrb[21].mxu1 }
0x1073   :  { %v1190_v55 = vadd.f32 %v1259_v59, %v1189_v4 }
0x1074   :  { %1213 = vst [vmem:[%s1979_s6 + $0x28] sm:$0xff] %v1195_v39 }
0x1075   :  { %1212 = vst [vmem:[%s1979_s6 + $0x20] sm:$0xff] %v1190_v55  ;;  %v1311_v5 = vpop.f32.mrb[22].mxu1 }
0x1076   :  { %v1205_v6 = vadd.f32 %v1311_v5, %v1259_v59  ;;  %v1199_v56 = vpop.f32.mrb[23].mxu1 }
0x1077   :  { %v1200_v7 = vadd.f32 %v1259_v59, %v1199_v56 }
0x1078   :  { %1215 = vst [vmem:[%s1979_s6 + $0x38] sm:$0xff] %v1205_v6 }
0x1079   :  { %1214 = vst [vmem:[%s1979_s6 + $0x30] sm:$0xff] %v1200_v7 }

</bundles_post_ra>
